<compile_context>
chip_gen: v7x
topology: tpu7x:2x2x1
jax: 0.10.0
libtpu: 0.0.40
codegen_flags: <defaults>
</compile_context>

<pallas_src>
import jax
import jax.numpy as jnp
from jax.experimental import pallas as pl
from jax.experimental.pallas import tpu as pltpu

LANE = 128
MAX_SLAB_W = 2048          # cap on the lane width of the flattened 2-D slab
DEFAULT_SLAB_W = 1024      # fallback width when no 128-multiple divides x.size (pad path)


def _make_ste_kernel(num_levels: int, abs_max: float):
    """Kernel with all constants folded at trace time.

    Folded math (identical to the PyTorch forward):
        u = clamp(x * (L-1)/(2a), -(L-1)/2, (L-1)/2)   # clip commutes with the positive scale
        r = round(u + (L-1)/2)                         # integer level in [0, L-1]
        y = r * (2a/(L-1)) - a
    """
    scale = float(num_levels - 1)
    a = float(abs_max)
    half_scale = 0.5 * scale
    pre_scale = half_scale / a        # folds the 1/a divide and the *(L-1)/2 into one mul
    out_mul = 2.0 * a / scale

    def ste_kernel(x_ref, o_ref):
        x = x_ref[...].astype(jnp.float32)
        u = jnp.clip(x * pre_scale, -half_scale, half_scale)
        r = jnp.round(u + half_scale)
        o_ref[...] = (r * out_mul - a).astype(o_ref.dtype)

    return ste_kernel


def _tpu_generation():
    """(big_tiles_ok, multi_tensorcore, is_v5e) from the device kind string."""
    try:
        kind = jax.devices()[0].device_kind.lower()
    except Exception:
        kind = ""
    is_v5e = ("v5 lite" in kind) or ("v5e" in kind) or ("v5litepod" in kind)
    big_tiles = ("v6" in kind) or ("v7" in kind)   # >= 32 MiB default scoped VMEM
    multi_tc = ("v7" in kind) or ("v4" in kind)    # two TensorCores share the grid
    return big_tiles, multi_tc, is_v5e


def _choose_slab_width(n, shape, sub_mult):
    """Pick a lane width W (multiple of 128) that divides n exactly, preferring widths
    that keep whole sublanes filled (rows >= sub_mult). Returns None if no exact
    divisor exists (caller takes the pad path)."""
    candidates = set()
    t = 1
    for d in reversed(shape):
        t *= int(d)
        if t % LANE == 0 and t <= MAX_SLAB_W and n % t == 0:
            candidates.add(t)
    for w in (2048, 1024, 512, 256, 128):
        if n % w == 0:
            candidates.add(w)
    if not candidates:
        return None
    full_rows = [w for w in candidates if (n // w) >= sub_mult]
    pool = full_rows if full_rows else list(candidates)
    return max(pool)


def ste_activation_forward(x, abs_max_value=1.5, num_levels=2 ** 8 - 1,
                           started=True, donate_input=False):
    """Pallas-backed STEActivation forward. x: any floating-point array (e.g. NCHW)."""
    if not started:
        return x

    orig_shape = x.shape
    dtype = x.dtype
    if not jnp.issubdtype(dtype, jnp.floating):
        # Integer inputs would be truncated by the final cast and are not the PyTorch
        # semantics of this module (it quantizes float activations onto a float grid).
        raise TypeError(f"STEActivation expects a floating-point tensor, got {dtype}")
    n = x.size
    if n == 0:
        return x

    itemsize = jnp.dtype(dtype).itemsize
    # Packed-dtype sublane alignment: f32 -> 8, bf16/f16 -> 16 rows.
    sub_mult = max(8, 32 // itemsize)

    big_tiles, multi_tc, is_v5e = _tpu_generation()

    # Lane width: prefer an exact divisor of n built from the trailing dims so the
    # wrapper never pads or slices (no extra HBM passes).
    slab_w = _choose_slab_width(n, orig_shape, sub_mult)
    pad_needed = slab_w is None
    if pad_needed:
        slab_w = DEFAULT_SLAB_W
    rows = pl.cdiv(n, slab_w)
    padded = rows * slab_w

    # Tile size: ~4 MiB on v6e/v7x, ~2 MiB otherwise (2 arrays x 2 buffers x 2 MiB
    # = 8 MiB fits v5e's 16 MiB default scoped VMEM without an override).
    target_block_bytes = (4 if big_tiles else 2) * 1024 * 1024
    block_rows_target = max(sub_mult, target_block_bytes // (slab_w * itemsize))
    block_rows_target = ((block_rows_target + sub_mult - 1) // sub_mult) * sub_mult

    if rows <= block_rows_target:
        # Whole slab fits one tile. Split 2-ways only on multi-TensorCore chips and
        # only when it costs no padding / partial block.
        if multi_tc and rows >= 2 * sub_mult and rows % (2 * sub_mult) == 0:
            block_rows = rows // 2
            grid_n = 2
        else:
            block_rows = rows          # full-dim block: no (8,128) divisibility needed
            grid_n = 1
    else:
        block_rows = block_rows_target
        grid_n = pl.cdiv(rows, block_rows)   # partial last block is masked by Pallas
        # On 2-TensorCore chips keep the step count even so neither core idles on the
        # final step of a bandwidth-bound kernel.
        if multi_tc and grid_n > 1 and grid_n % 2 == 1:
            cand_rows = pl.cdiv(rows, grid_n + 1)
            cand_rows = ((cand_rows + sub_mult - 1) // sub_mult) * sub_mult
            cand_grid = pl.cdiv(rows, cand_rows)
            if cand_grid % 2 == 0:
                block_rows, grid_n = cand_rows, cand_grid

    flat = x.reshape(-1)
    if pad_needed and padded != n:
        # TODO(synk): a masked tail inside the kernel would avoid this extra HBM pass;
        # it only triggers when no multiple of 128 divides x.size.
        flat = jnp.pad(flat, (0, padded - n))
    x2d = flat.reshape(rows, slab_w)

    kernel = _make_ste_kernel(num_levels, float(abs_max_value))

    cp_kwargs = dict(dimension_semantics=("parallel",))
    if not is_v5e:
        # Plenty of headroom for the 4 MiB tiles on v6e/v7x (well under physical VMEM).
        cp_kwargs["vmem_limit_bytes"] = 32 * 1024 * 1024

    out2d = pl.pallas_call(
        kernel,
        out_shape=jax.ShapeDtypeStruct((rows, slab_w), dtype),
        grid=(grid_n,),
        in_specs=[pl.BlockSpec((block_rows, slab_w), lambda i: (i, 0))],
        out_specs=pl.BlockSpec((block_rows, slab_w), lambda i: (i, 0)),
        compiler_params=pltpu.CompilerParams(**cp_kwargs),
        # Reuse the input HBM buffer for the output only if the caller promises it no
        # longer needs x (halves peak HBM footprint for large activation tensors).
        input_output_aliases=({0: 0} if donate_input else {}),
    )(x2d)

    out_flat = out2d.reshape(-1)
    if pad_needed and padded != n:
        out_flat = out_flat[:n]
    return out_flat.reshape(orig_shape)


def ste_activation_reference_folded(x, abs_max_value, num_levels=2 ** 8 - 1):
    """Reference using the same constant fold as the kernel (mathematically identical
    to the PyTorch forward; division replaced by multiply-by-reciprocal)."""
    scale = float(num_levels - 1)
    a = float(abs_max_value)
    half_scale = 0.5 * scale
    u = jnp.clip(x.astype(jnp.float32) * (half_scale / a), -half_scale, half_scale)
    r = jnp.round(u + half_scale)
    return (r * (2.0 * a / scale) - a).astype(x.dtype)


def ste_activation_reference_literal(x, abs_max_value, num_levels=2 ** 8 - 1):
    """Literal transcription of the PyTorch forward (uses true division)."""
    a = jnp.float32(abs_max_value)
    y = x.astype(jnp.float32) / a
    y = jnp.clip(y, -1.0, 1.0)
    y = (y + 1.0) / 2.0
    y = jnp.round(y * (num_levels - 1)) / (num_levels - 1)
    y = 2.0 * y - 1.0
    return (y * a).astype(x.dtype)


# TODO(synk): the monitoring-epoch abs-max tracking (stateful Parameter update) and the
# STE backward (detach trick) are training-loop concerns, not part of this forward kernel.

if __name__ == "__main__":
    key = jax.random.PRNGKey(0)
    abs_max_value = 1.5            # deterministic module constant from __init__
    num_levels = 2 ** 8 - 1
    quant_step = 2.0 * abs_max_value / (num_levels - 1)

    # Primary case: small NCHW conv activation, f32.
    B, C, H, W = 2, 4, 16, 16
    x = jax.random.normal(key, (B, C, H, W), dtype=jnp.float32) * 2.0

    y = ste_activation_forward(x, abs_max_value, num_levels=num_levels, started=True)
    y = jax.block_until_ready(y)
    assert y.shape == x.shape and y.dtype == x.dtype

    # Tight check vs the fold-equivalent reference (same math as the kernel).
    y_ref = ste_activation_reference_folded(x, abs_max_value, num_levels=num_levels)
    assert jnp.allclose(y, y_ref, atol=1e-5), "mismatch vs folded reference (f32)"

    # Semantic sanity vs the literal torch-style formula: any residual difference can
    # only be an exact rounding tie flipped by <= 1 quantization level.
    y_lit = ste_activation_reference_literal(x, abs_max_value, num_levels=num_levels)
    assert float(jnp.max(jnp.abs(y.astype(jnp.float32) - y_lit.astype(jnp.float32)))) <= quant_step + 1e-5

    # Secondary cases: bf16 input, a non-8-aligned row count, and the (rare) pad path.
    extra_cases = [
        (jax.random.normal(jax.random.PRNGKey(1), (2, 4, 16, 16), dtype=jnp.bfloat16) * 2.0, 2e-2),
        (jax.random.normal(jax.random.PRNGKey(2), (2, 3, 24, 24), dtype=jnp.float32) * 2.0, 1e-5),
        (jax.random.normal(jax.random.PRNGKey(3), (2, 3, 5, 7), dtype=jnp.float32) * 2.0, 1e-5),
    ]
    for xe, tol in extra_cases:
        ye = jax.block_until_ready(
            ste_activation_forward(xe, abs_max_value, num_levels=num_levels, started=True))
        assert ye.shape == xe.shape and ye.dtype == xe.dtype
        ye_ref = ste_activation_reference_folded(xe, abs_max_value, num_levels=num_levels)
        assert jnp.allclose(ye.astype(jnp.float32), ye_ref.astype(jnp.float32), atol=tol), \
            f"mismatch vs folded reference for shape {xe.shape} dtype {xe.dtype}"

    print("KERNEL_OK")
</pallas_src>

<mosaic_0001>
module attributes {stable_mosaic.version = 11 : i64} {
  func.func @ste_kernel(%arg0: i32, %arg1: memref<8x256xf32, #tpu.memory_space<vmem>>, %arg2: memref<8x256xf32, #tpu.memory_space<vmem>>) attributes {dimension_semantics = [#tpu.dimension_semantics<parallel>], iteration_bounds = array<i64: 1>, scalar_prefetch = 0 : i64, scratch_operands = 0 : i64, tpu.core_type = #tpu.core_type<tc>, window_params = [{transform_indices = @transform_0, window_bounds = array<i64: 8, 256>}, {transform_indices = @transform_1, window_bounds = array<i64: 8, 256>}]} {
    %c0 = arith.constant 0 : index
    %c0_0 = arith.constant 0 : index
    %0 = vector.load %arg1[%c0, %c0_0] : memref<8x256xf32, #tpu.memory_space<vmem>>, vector<8x256xf32>
    %cst = arith.constant 84.6666641 : f32
    %1 = vector.broadcast %cst : f32 to vector<8x256xf32>
    %2 = arith.mulf %0, %1 : vector<8x256xf32>
    %cst_1 = arith.constant -1.270000e+02 : f32
    %cst_2 = arith.constant 1.270000e+02 : f32
    %3 = vector.broadcast %cst_1 : f32 to vector<8x256xf32>
    %4 = arith.maximumf %3, %2 : vector<8x256xf32>
    %5 = vector.broadcast %cst_2 : f32 to vector<8x256xf32>
    %6 = arith.minimumf %5, %4 : vector<8x256xf32>
    %cst_3 = arith.constant 1.270000e+02 : f32
    %7 = vector.broadcast %cst_3 : f32 to vector<8x256xf32>
    %8 = arith.addf %6, %7 : vector<8x256xf32>
    %9 = math.roundeven %8 : vector<8x256xf32>
    %cst_4 = arith.constant 0.0118110236 : f32
    %10 = vector.broadcast %cst_4 : f32 to vector<8x256xf32>
    %11 = arith.mulf %9, %10 : vector<8x256xf32>
    %cst_5 = arith.constant 1.500000e+00 : f32
    %12 = vector.broadcast %cst_5 : f32 to vector<8x256xf32>
    %13 = arith.subf %11, %12 : vector<8x256xf32>
    %c0_6 = arith.constant 0 : index
    %c0_7 = arith.constant 0 : index
    %14 = vector.load %arg2[%c0_6, %c0_7] : memref<8x256xf32, #tpu.memory_space<vmem>>, vector<8x256xf32>
    tpu.vector_store %arg2[%c0_6, %c0_7], %13 {strides = array<i32>} : memref<8x256xf32, #tpu.memory_space<vmem>>, vector<8x256xf32>,
    return
  }
  func.func @transform_0(%arg0: i32) -> (i32, i32) {
    %c0_i32 = arith.constant 0 : i32
    %c0_i32_0 = arith.constant 0 : i32
    return %arg0, %c0_i32 : i32, i32
  }
  func.func @transform_1(%arg0: i32) -> (i32, i32) {
    %c0_i32 = arith.constant 0 : i32
    %c0_i32_0 = arith.constant 0 : i32
    return %arg0, %c0_i32 : i32, i32
  }
}

</mosaic_0001>

<bundles_post_ra>
// kernel: tpu_custom_call.1
= control target key start
LH: loop header
LB: loop body
LE: loop exit
PB: predicated region body
PF: predicated region fallthrough
CT: control target
= control target key end

     0   :  { %6 = vsyncpa [#allocation3], 0  ;;  %s146_s0 = inlined_call_operand.hbm [shape: f32[8,256], index: 0, kind: input, shape index: {}]   ;;  %s147_s1 = inlined_call_operand.hbm [shape: f32[8,256], index: 1, kind: output, shape index: {}]  }
   0x1   :  { %7 = vsyncpa [#allocation4], 0  ;;  %s110_s6 = smov [#allocation2]   ;;  %s62_s10 = scalar_lea.hbm %s146_s0, 256 }
   0x2   :  { %s14_s7 = sshll.u32 %s110_s6, 4  ;;  %p63_p0 = scmp.ne.s32.totalorder %s146_s0, %s62_s10  ;;  %s15_s7 = int_to_ptr.vmem [resolvable:$true] %s14_s7 }
   0x3   :  { %p66_p1 = scmp.lt.u32.totalorder %s62_s10, %s146_s0 }
   0x5   :  { %p68_p2 = pnand %p66_p1, %p63_p0 }
   0x7   :  { %71 = shalt.err (!%p68_p2)
}
   0x8   :  { %s72_s15 = scalar_lea.vmem %s15_s7, 256  ;;  %p77_p4 = scmp.lt.s32.totalorder %s15_s7, %s15_s7 }
   0x9   :  { %p73_p3 = scmp.ne.s32.totalorder %s15_s7, %s72_s15  ;;  %p78_p5 = scmp.lt.s32.totalorder %s72_s15, %s72_s15 }
   0xb   :  { %p79_p6 = por %p78_p5, %p77_p4 }
   0xd   :  { %p80_p7 = pnand %p79_p6, %p73_p3 }
   0xf   :  { %83 = shalt.err (!%p80_p7)
}
  0x10   :  { %17 = dma.hbm_to_vmem [thread:$0]  %s146_s0, 256, %s15_s7, [#allocation3]  }
  0x11   :  { %106 = dma.done.wait [#allocation3], 256  }
  0x12   :  { %107 = vsyncadd [#allocation3], 4294967040  ;;  %v21_v0 = vld [vmem:[#allocation2] sm:$0xff]  ;;  %v22_v1 = vld [vmem:[#allocation2 + $0x8] sm:$0xff]  ;;  %s111_s18 = smov [#allocation5]  }
  0x13   :  { %v23_v2 = vmul.f32 84.666664, %v21_v0  ;;  %v24_v3 = vmul.f32 84.666664, %v22_v1  ;;  %s45_s19 = sshll.u32 %s111_s18, 4  ;;  %s46_s19 = int_to_ptr.vmem [resolvable:$true] %s45_s19 }
  0x14   :  { %s84_s0 = scalar_lea.vmem %s46_s19, 256  ;;  %p89_p9 = scmp.lt.s32.totalorder %s46_s19, %s46_s19 }
  0x15   :  { %v54_v4 = vclamps-f32 %v23_v2, 127.0  ;;  %v55_v5 = vclamps-f32 %v24_v3, 127.0  ;;  %p85_p8 = scmp.ne.s32.totalorder %s46_s19, %s84_s0  ;;  %p90_p10 = scmp.lt.s32.totalorder %s84_s0, %s84_s0 }
  0x17   :  { %v29_v6 = vadd.f32 127.0, %v54_v4  ;;  %v30_v7 = vadd.f32 127.0, %v55_v5  ;;  %p91_p11 = por %p90_p10, %p89_p9 }
  0x19   :  { %v58_v8 = vround.rtne.f32 %v29_v6  ;;  %v59_v9 = vround.rtne.f32 %v30_v7  ;;  %p92_p12 = pnand %p91_p11, %p85_p8 }
  0x1b   :  { %v33_v10 = vmul.f32 0.011811024, %v58_v8  ;;  %v34_v11 = vmul.f32 0.011811024, %v59_v9 }
  0x1d   :  { %v56_v12 = vadd.f32 -1.5, %v33_v10  ;;  %v57_v13 = vadd.f32 -1.5, %v34_v11 }
  0x1f   :  { %37 = vst [vmem:[#allocation5] sm:$0xff] %v56_v12  ;;  %38 = vst [vmem:[#allocation5 + $0x8] sm:$0xff] %v57_v13 }
  0x20   :  { %95 = shalt.err (!%p92_p12)
}
  0x21   :  { %s96_s22 = scalar_lea.hbm %s147_s1, 256 }
  0x22   :  { %p97_p13 = scmp.ne.s32.totalorder %s147_s1, %s96_s22  ;;  %p100_p0 = scmp.lt.u32.totalorder %s96_s22, %s147_s1 }
  0x24   :  { %p102_p1 = pnand %p100_p0, %p97_p13 }
  0x26   :  { %105 = shalt.err (!%p102_p1)
}
  0x27   :  { %48 = dma.vmem_to_hbm [thread:$0]  %s46_s19, 256, %s147_s1, [#allocation4]  }
  0x28   :  { %108 = dma.done.wait [#allocation4], 256  }
  0x29   :  { %109 = vsyncadd [#allocation4], 4294967040 }
  0x2a   :  { %52 = vsyncpa [#allocation3], 1 }
  0x2b   :  { %53 = vsyncpa [#allocation4], 1 }

</bundles_post_ra>
